<compile_context>
chip_gen: v5e
topology: v5e:2x2
jax: 0.10.0
libtpu: 0.0.40
codegen_flags: <defaults>
</compile_context>

<pallas_src>
import functools

import numpy as np
import jax
import jax.numpy as jnp
from jax import lax
from jax.experimental import pallas as pl
from jax.experimental.pallas import tpu as pltpu


# ----------------------------------------------------------------------------
# Parameter / buffer construction (deterministic, synthetic — no checkpoint).
# ----------------------------------------------------------------------------
def pmf_to_quantized_cdf_np(pmf, precision=16):
    """Simplified numpy stand-in for compressai's C++ pmf_to_quantized_cdf."""
    pmf = np.asarray(pmf, dtype=np.float64)
    cdf = np.zeros(pmf.shape[0] + 1, dtype=np.int64)
    cdf[1:] = np.round(np.cumsum(pmf) / pmf.sum() * (1 << precision)).astype(np.int64)
    for i in range(1, cdf.shape[0]):           # enforce strictly increasing
        if cdf[i] <= cdf[i - 1]:
            cdf[i] = cdf[i - 1] + 1
    cdf[-1] = 1 << precision
    return cdf.astype(np.int32)


def build_synthetic_cdfs(num_cdfs=4, pmf_length=63, precision=16):
    """Deterministic synthetic _quantized_cdf / _cdf_length / _offset buffers."""
    max_length = pmf_length
    qcdf = np.zeros((num_cdfs, max_length + 2), dtype=np.int32)
    cdf_length = np.zeros((num_cdfs,), dtype=np.int32)
    offset = np.zeros((num_cdfs,), dtype=np.int32)
    xs = np.arange(pmf_length, dtype=np.float64) - pmf_length // 2
    for i in range(num_cdfs):
        scale = 2.0 * (i + 1)
        p = np.exp(-0.5 * (xs / scale) ** 2)
        p = p / p.sum()
        p = 0.9 * p + 0.1 / pmf_length        # mix with uniform -> no zero bins
        tail = max(1.0 - p.sum(), 0.0)
        prob = np.concatenate([p, [tail]])
        c = pmf_to_quantized_cdf_np(prob, precision)
        qcdf[i, : c.shape[0]] = c
        cdf_length[i] = c.shape[0]             # == pmf_length + 2
        offset[i] = -(pmf_length // 2)
    return qcdf, cdf_length, offset


def _round_up(x, m):
    return ((x + m - 1) // m) * m


def _pick_tile_rows(rows, max_tile):
    """Largest multiple-of-8 divisor of `rows` that is <= max_tile.

    `rows` is always a multiple of 8, so this never forces an extra pad of the
    flattened tensor up to a multiple of the tile (perf review: the pad +
    output-slice passes cost extra full HBM read/writes for bandwidth-bound
    ops).
    """
    if rows <= max_tile:
        return rows
    d = (max_tile // 8) * 8
    while d >= 8:
        if rows % d == 0:
            return d
        d -= 8
    return 8


# ----------------------------------------------------------------------------
# Kernel 1: LowerBound (likelihood_lower_bound) — elementwise max(x, bound).
# ----------------------------------------------------------------------------
def _lower_bound_kernel(x_ref, o_ref, *, bound):
    o_ref[...] = jnp.maximum(x_ref[...], bound).astype(o_ref.dtype)


def likelihood_lower_bound(x, bound=1e-9, max_tile_rows=1024):
    """Elementwise max(x, bound) with large lane-dense tiles.

    max_tile_rows=1024 is near the measured HBM-roofline plateau on v5e/v6e
    within default scoped VMEM; on v7x raise to 2048-4096.
    TODO(synk): as a standalone op this is purely HBM-bandwidth bound; inside a
    real model jnp.maximum(x, bound) should be fused into the producer kernel
    instead of paying a full HBM round-trip here.
    """
    orig_shape = x.shape
    dtype = x.dtype
    flat = x.reshape(-1)
    n = flat.shape[0]
    lanes = 128
    rows = _round_up(pl.cdiv(n, lanes), 8)     # only 8-row alignment, no tile pad
    n_pad = rows * lanes
    if n_pad != n:
        flat = jnp.pad(flat, (0, n_pad - n))
    x2 = flat.reshape(rows, lanes)
    tile_rows = _pick_tile_rows(rows, max_tile_rows)

    out = pl.pallas_call(
        functools.partial(_lower_bound_kernel, bound=float(bound)),
        out_shape=jax.ShapeDtypeStruct((rows, lanes), dtype),
        grid=(rows // tile_rows,),
        in_specs=[pl.BlockSpec((tile_rows, lanes), lambda i: (i, 0))],
        out_specs=pl.BlockSpec((tile_rows, lanes), lambda i: (i, 0)),
        compiler_params=pltpu.CompilerParams(dimension_semantics=("parallel",)),
    )(x2)
    out = out.reshape(-1)
    if n_pad != n:
        out = out[:n]
    return out.reshape(orig_shape)


# ----------------------------------------------------------------------------
# Kernel 2: compress(cdf_sancheck=True) bit-cost path (lane-dense).
#
# Layout: elements are lane-dense — HBM slabs of shape (rows, 128).  Per grid
# step a (rows_per_block, 128) block is processed in three stages:
#   1) block-wide integer stages: clamp idx, gather offset/cdf_length from
#      SMEM scalars with a K-way where-chain, s = clip(sym - off, 0, clen-2);
#      s and idx land in VMEM scratch.
#   2) fori_loop over rows (unroll=2): per 128-lane row build a one-hot over
#      the `bins` (<=64, on the sublane axis) symbol bins and do one
#      (K_pad, bins)@(bins, 128) MXU matmul with the host-precomputed diff
#      table D[k, s] = cdf[k, s+1] - cdf[k, s]; the CDF-row pick is
#      sum_k cand * onehot(idx) (full-vreg multiply + sublane reduction);
#      pmf rows land in VMEM scratch.
#   3) block-wide bits = precision - log2(pmf) and one full-tile unmasked
#      store to the output block.
# ----------------------------------------------------------------------------
def _bits_kernel(off_ref, len_ref, sym_ref, idx_ref, d_ref, bits_ref,
                 s_scr, idx_scr, pmf_scr, *,
                 precision, num_cdfs, k_pad, rows_per_block, bins, unroll):
    # ---- Stage 1: block-wide scalar stages on the full (R,128) tile ----
    # Clamp indexes so out-of-range values cannot yield pmf=0 -> inf bits
    # (the torch reference would raise an indexing error instead).
    idx = jnp.clip(idx_ref[...], 0, num_cdfs - 1)                 # (R,128) i32
    off = jnp.where(idx == 0, off_ref[0], 0)
    clen = jnp.where(idx == 0, len_ref[0], 0)
    for k in range(1, num_cdfs):                                  # K is small
        off = jnp.where(idx == k, off_ref[k], off)
        clen = jnp.where(idx == k, len_ref[k], clen)
    s_scr[...] = jnp.clip(sym_ref[...] - off, 0, clen - 2)        # (R,128) i32
    idx_scr[...] = idx

    # ---- Stage 2: per-row one-hot + MXU gather of pmf = D[idx, s] ----
    d = d_ref[...]                                                # (K_pad, bins) f32
    iota_bins = lax.broadcasted_iota(jnp.int32, (bins, 128), 0)   # hoisted
    iota_k = lax.broadcasted_iota(jnp.int32, (k_pad, 128), 0)     # hoisted

    def row_body(r, carry):
        s_row = s_scr[pl.ds(r, 1), :]                             # (1,128)
        i_row = idx_scr[pl.ds(r, 1), :]                           # (1,128)
        onehot_s = (iota_bins == s_row).astype(jnp.float32)       # (bins,128)
        # D stays the small LHS; shrinking bins to 64 halves the weight push.
        cand = jnp.dot(d, onehot_s,
                       preferred_element_type=jnp.float32)        # (K_pad,128)
        onehot_k = (iota_k == i_row).astype(jnp.float32)          # (K_pad,128)
        pmf_scr[pl.ds(r, 1), :] = jnp.sum(cand * onehot_k, axis=0,
                                          keepdims=True)          # (1,128)
        return carry

    # fori_loop (not a static Python unroll) bounds live ranges; unroll=2 keeps
    # the per-iteration one-hot (8 vregs) + temps comfortably inside 64 vregs.
    lax.fori_loop(0, rows_per_block, row_body, 0, unroll=unroll)

    # ---- Stage 3: block-wide bits + one full-tile unmasked store ----
    bits_ref[...] = jnp.float32(precision) - jnp.log2(pmf_scr[...])


def compress_sancheck_bits(symbols, indexes, d_pad, cdf_length_dev, offset_dev,
                           *, num_cdfs, bins, k_pad, precision=16.0,
                           max_rows_per_block=256, unroll=2):
    shape = symbols.shape
    n = int(np.prod(shape))
    lanes = 128

    rows = _round_up(pl.cdiv(n, lanes), 8)     # only 8-row alignment, no tile pad
    n_pad = rows * lanes

    sym = jnp.asarray(symbols, jnp.int32).reshape(-1)
    idx = jnp.asarray(indexes, jnp.int32).reshape(-1)
    if n_pad != n:
        sym = jnp.pad(sym, (0, n_pad - n))     # padded elems: sym=0, idx=0 (valid)
        idx = jnp.pad(idx, (0, n_pad - n))
    sym2 = sym.reshape(rows, lanes)
    idx2 = idx.reshape(rows, lanes)

    rows_per_block = _pick_tile_rows(rows, max_rows_per_block)

    kernel = functools.partial(
        _bits_kernel, precision=float(precision), num_cdfs=num_cdfs,
        k_pad=k_pad, bins=bins, rows_per_block=rows_per_block, unroll=unroll)

    grid_spec = pltpu.PrefetchScalarGridSpec(
        num_scalar_prefetch=2,                 # offset, cdf_length -> SMEM
        grid=(rows // rows_per_block,),
        in_specs=[
            pl.BlockSpec((rows_per_block, lanes), lambda i, off, ln: (i, 0)),  # symbols
            pl.BlockSpec((rows_per_block, lanes), lambda i, off, ln: (i, 0)),  # indexes
            pl.BlockSpec((k_pad, bins), lambda i, off, ln: (0, 0)),            # diff table
        ],
        out_specs=pl.BlockSpec((rows_per_block, lanes), lambda i, off, ln: (i, 0)),
        scratch_shapes=[
            pltpu.VMEM((rows_per_block, lanes), jnp.int32),    # s
            pltpu.VMEM((rows_per_block, lanes), jnp.int32),    # clamped idx
            pltpu.VMEM((rows_per_block, lanes), jnp.float32),  # pmf
        ],
    )

    bits = pl.pallas_call(
        kernel,
        out_shape=jax.ShapeDtypeStruct((rows, lanes), jnp.float32),
        grid_spec=grid_spec,
        compiler_params=pltpu.CompilerParams(dimension_semantics=("parallel",)),
    )(offset_dev, cdf_length_dev, sym2, idx2, d_pad)
    bits = bits.reshape(-1)
    if n_pad != n:
        bits = bits[:n]
    return bits.reshape(shape)


# ----------------------------------------------------------------------------
# Minimal EntropyModel equivalent holding the buffers (device tables cached).
# ----------------------------------------------------------------------------
class EntropyModelPallas:
    def __init__(self, entropy_coder_precision=16, likelihood_bound=1e-9,
                 num_cdfs=4, pmf_length=63):
        self.entropy_coder_precision = int(entropy_coder_precision)
        self.likelihood_bound = float(likelihood_bound)
        qcdf, cdf_len, off = build_synthetic_cdfs(
            num_cdfs=num_cdfs, pmf_length=pmf_length,
            precision=self.entropy_coder_precision)
        self._quantized_cdf = qcdf       # int32 (num_cdfs, max_length + 2)
        self._cdf_length = cdf_len       # int32 (num_cdfs,)
        self._offset = off               # int32 (num_cdfs,)

        # Device-resident tables built once (no per-call host rebuild / H2D).
        K, L = qcdf.shape
        bins = _round_up(L - 1, 8)       # true bin count, not padded to 128
        assert bins <= 512, "CDF table too wide for the one-hot gather kernel"
        k_pad = _round_up(K, 8)
        # D[k, s] = cdf[k, s+1] - cdf[k, s] (the pmfs). f32 is exact <= 2^16;
        # keep f32 (bf16 would lose exactness; v7x MXU has no int mode).
        d = np.zeros((k_pad, bins), dtype=np.float32)
        d[:K, : L - 1] = (qcdf[:, 1:].astype(np.int64)
                          - qcdf[:, :-1].astype(np.int64)).astype(np.float32)
        self._d_pad = jnp.asarray(d)                                 # (K_pad, bins)
        self._off_dev = jnp.asarray(off.reshape(-1).astype(np.int32))   # (K,)
        self._len_dev = jnp.asarray(cdf_len.reshape(-1).astype(np.int32))  # (K,)
        self._num_cdfs = K
        self._bins = bins
        self._k_pad = k_pad

    def lower_bound(self, likelihoods):
        return likelihood_lower_bound(likelihoods, self.likelihood_bound)

    def sancheck_bits(self, symbols, indexes):
        return compress_sancheck_bits(
            symbols, indexes, self._d_pad, self._len_dev, self._off_dev,
            num_cdfs=self._num_cdfs, bins=self._bins, k_pad=self._k_pad,
            precision=float(self.entropy_coder_precision))

    # TODO(synk): rANS / range-coder encode_with_indexes / decode_with_indexes are
    # serial byte-stream algorithms with no Pallas TPU equivalent; not translated.


# ----------------------------------------------------------------------------
# Demo / self-check
# ----------------------------------------------------------------------------
if __name__ == "__main__":
    key = jax.random.PRNGKey(0)
    B, C, H, W = 2, 4, 16, 16                       # NCHW-like tensor sizes

    model = EntropyModelPallas(num_cdfs=C)

    # --- likelihood lower bound ---
    k1, k2 = jax.random.split(key)
    likelihoods = jax.random.uniform(k1, (B, C, H, W), jnp.float32,
                                     minval=-1e-8, maxval=1.0)
    lb = jax.block_until_ready(model.lower_bound(likelihoods))
    lb_ref = np.maximum(np.asarray(likelihoods), 1e-9)
    assert np.allclose(np.asarray(lb), lb_ref), "lower-bound mismatch"

    # --- cdf sancheck bit cost ---
    symbols = jax.random.randint(k2, (B, C, H, W), -20, 21, dtype=jnp.int32)
    indexes = jnp.broadcast_to(
        jnp.arange(C, dtype=jnp.int32)[None, :, None, None], (B, C, H, W))
    bits = jax.block_until_ready(model.sancheck_bits(symbols, indexes))

    sym_np = np.asarray(symbols).astype(np.int64)
    idx_np = np.asarray(indexes).astype(np.int64)
    off_np = model._offset[idx_np]
    s_np = np.clip(sym_np - off_np, 0, model._cdf_length[idx_np] - 2)
    pmf_np = (model._quantized_cdf[idx_np, s_np + 1]
              - model._quantized_cdf[idx_np, s_np]).astype(np.float64)
    bits_ref = -np.log2(pmf_np) + 16.0
    assert np.allclose(np.asarray(bits), bits_ref, rtol=1e-5, atol=1e-5), "bits mismatch"

    print("KERNEL_OK")
</pallas_src>

<mosaic_0001>
module attributes {stable_mosaic.version = 11 : i64} {
  func.func @_lower_bound_kernel(%arg0: i32, %arg1: memref<16x128xf32, #tpu.memory_space<vmem>>, %arg2: memref<16x128xf32, #tpu.memory_space<vmem>>) attributes {dimension_semantics = [#tpu.dimension_semantics<parallel>], iteration_bounds = array<i64: 1>, scalar_prefetch = 0 : i64, scratch_operands = 0 : i64, tpu.core_type = #tpu.core_type<tc>, window_params = [{transform_indices = @transform_0, window_bounds = array<i64: 16, 128>}, {transform_indices = @transform_1, window_bounds = array<i64: 16, 128>}]} {
    %c0 = arith.constant 0 : index
    %c0_0 = arith.constant 0 : index
    %0 = vector.load %arg1[%c0, %c0_0] : memref<16x128xf32, #tpu.memory_space<vmem>>, vector<16x128xf32>
    %cst = arith.constant 9.99999971E-10 : f32
    %1 = vector.broadcast %cst : f32 to vector<16x128xf32>
    %2 = arith.maximumf %0, %1 : vector<16x128xf32>
    %c0_1 = arith.constant 0 : index
    %c0_2 = arith.constant 0 : index
    %3 = vector.load %arg2[%c0_1, %c0_2] : memref<16x128xf32, #tpu.memory_space<vmem>>, vector<16x128xf32>
    tpu.vector_store %arg2[%c0_1, %c0_2], %2 {strides = array<i32>} : memref<16x128xf32, #tpu.memory_space<vmem>>, vector<16x128xf32>,
    return
  }
  func.func @transform_0(%arg0: i32) -> (i32, i32) {
    %c0_i32 = arith.constant 0 : i32
    %c0_i32_0 = arith.constant 0 : i32
    return %arg0, %c0_i32 : i32, i32
  }
  func.func @transform_1(%arg0: i32) -> (i32, i32) {
    %c0_i32 = arith.constant 0 : i32
    %c0_i32_0 = arith.constant 0 : i32
    return %arg0, %c0_i32 : i32, i32
  }
}

</mosaic_0001>

<bundles_post_ra>
// kernel: tpu_custom_call.1
= control target key start
LH: loop header
LB: loop body
LE: loop exit
PB: predicated region body
PF: predicated region fallthrough
CT: control target
= control target key end

     0   :  { %6 = vsyncpa [#allocation3], 0  ;;  %s126_s0 = inlined_call_operand.hbm [shape: f32[16,128], index: 0, kind: input, shape index: {}]   ;;  %s127_s1 = inlined_call_operand.hbm [shape: f32[16,128], index: 1, kind: output, shape index: {}]  }
   0x1   :  { %7 = vsyncpa [#allocation4], 0  ;;  %s12_s8 = sshll.u32 %s126_s0, 4  ;;  %s106_s9 = smov [#allocation2]   ;;  %s13_s8 = int_to_ptr.hbm [resolvable:$true] %s12_s8 }
   0x2   :  { %s14_s10 = sshll.u32 %s106_s9, 4  ;;  %s107_s11 = smov 128   ;;  %s15_s10 = int_to_ptr.vmem [resolvable:$true] %s14_s10 }
   0x3   :  { %s108_s12 = smov 8  }
   0x4   :  { %20 = dma.hbm_to_vmem [thread:$0]  %s13_s8, 256, %s15_s10, [#allocation3], %s107_s11, %s107_s11, %s108_s12  }
   0x5   :  { %102 = dma.done.wait [#allocation3], 256  }
   0x6   :  { %103 = vsyncadd [#allocation3], 4294967040  ;;  %s109_s13 = smov [#allocation5]   ;;  %s37_s17 = sshll.u32 %s127_s1, 4  ;;  %v25_v0 = vld [vmem:[#allocation2] sm:$0xff]  ;;  %v26_v1 = vld [vmem:[#allocation2 + $0x8] sm:$0xff]  ;;  %s38_s17 = int_to_ptr.hbm [resolvable:$true] %s37_s17 }
   0x7   :  { %s35_s14 = sshll.u32 %s109_s13, 4  ;;  %v27_v2 = vmax.f32 %v25_v0, 1e-09  ;;  %v28_v3 = vmax.f32 %v26_v1, 1e-09  ;;  %s36_s14 = int_to_ptr.vmem [resolvable:$true] %s35_s14 }
   0x9   :  { %29 = vst [vmem:[#allocation5] sm:$0xff] %v27_v2 }
   0xa   :  { %30 = vst [vmem:[#allocation5 + $0x8] sm:$0xff] %v28_v3 }
   0xb   :  { %43 = dma.vmem_to_hbm [thread:$0]  %s36_s14, 256, %s38_s17, [#allocation4], %s107_s11, %s107_s11, %s108_s12  }
   0xc   :  { %104 = dma.done.wait [#allocation4], 256  }
   0xd   :  { %105 = vsyncadd [#allocation4], 4294967040 }
   0xe   :  { %48 = vsyncpa [#allocation3], 1 }
   0xf   :  { %49 = vsyncpa [#allocation4], 1 }

</bundles_post_ra>
